<compile_context>
chip_gen: v6e
topology: v6e:2x2x1
jax: 0.10.0
libtpu: 0.0.40
codegen_flags: <defaults>
</compile_context>

<pallas_src>
import functools

import jax
import jax.numpy as jnp
from jax.experimental import pallas as pl
from jax.experimental.pallas import tpu as pltpu


def _round_up(x, m):
    return (x + m - 1) // m * m


def _cdiv(a, b):
    return -(-a // b)


def _mlp_kernel(fc_ref, x_ref, w1o_ref, w2_ref, b2_ref, o_ref):
    """One row-tile of `other` for one batch element.

    fc_ref : (1, H)          f32   focal @ W1[:F] + b1 for this batch element
    x_ref  : (tn, O)         f32   `other` rows (original dtype, cast in-kernel)
    w1o_ref: (O, H)          bf16  W1[F:] (the `other` columns), VMEM-resident
    w2_ref : (H, out_lanes)  bf16  W2 (lane-padded only when worthwhile)
    b2_ref : (1, out_lanes)  f32   b2 (matching lane padding)
    o_ref  : (tn, out_lanes) out dtype
    """
    # Cast to bf16 on the VPU (free filler under the DMA), then first Linear
    # (other part) on the MXU with f32 accumulation + precomputed focal/bias.
    x = x_ref[...].astype(w1o_ref.dtype)
    h = jnp.dot(x, w1o_ref[...], preferred_element_type=jnp.float32)
    h = jnp.tanh(h + fc_ref[...])
    # Second Linear (bf16 operands, f32 acc) + Sigmoid in f32.
    z = jnp.dot(h.astype(w2_ref.dtype), w2_ref[...],
                preferred_element_type=jnp.float32) + b2_ref[...]
    o_ref[...] = jax.nn.sigmoid(z).astype(o_ref.dtype)


@functools.partial(jax.jit, static_argnames=("tn", "out_dtype"))
def basic_module_forward(focal, other, w1, b1, w2, b2, *, tn=1024, out_dtype=None):
    """Pallas implementation of BasicModule.forward.

    focal: (B, 1, F)   other: (B, N, O)
    w1: (F+O, H)  b1: (H,)  w2: (H, Out)  b2: (Out,)
    Returns: (B, N, Out) in focal.dtype (or out_dtype if given).
    """
    B, _, F = focal.shape
    _, N, O = other.shape
    H = w1.shape[1]
    Out = w2.shape[1]
    assert w1.shape[0] == F + O, "w1 rows must equal F + O"

    f32, bf16 = jnp.float32, jnp.bfloat16
    out_dt = jnp.dtype(out_dtype) if out_dtype is not None else focal.dtype

    # --- focal contribution + b1, once per batch element (tiny; plain XLA).
    fc = focal.reshape(B, F).astype(f32) @ w1[:F].astype(f32) + b1.astype(f32)[None, :]
    fc3 = fc.reshape(B, 1, H)                        # (B, 1, H) f32
    w1_o = w1[F:].astype(bf16)                       # (O, H)   bf16

    # --- output lanes: narrow store for small Out; pad to 128 only when it pays.
    if Out >= 64 and Out % 128 != 0:
        out_lanes = _round_up(Out, 128)
    else:
        out_lanes = Out
    if out_lanes != Out:
        w2_p = jnp.pad(w2.astype(bf16), ((0, 0), (0, out_lanes - Out)))
        b2_p = jnp.pad(b2.astype(f32), (0, out_lanes - Out)).reshape(1, out_lanes)
    else:
        w2_p = w2.astype(bf16)
        b2_p = b2.astype(f32).reshape(1, Out)

    # --- balanced row tiling over the sequence dim (cdiv grid, no pad pass).
    tn_cap = _round_up(max(16, min(tn, 2048)), 16)
    if N <= tn_cap:
        tn_eff = N                                  # full dim: always a legal block
    else:
        n_tiles = _cdiv(N, tn_cap)
        tn_eff = _round_up(_cdiv(N, n_tiles), 16)   # balanced, <16 rows waste
    if B == 1 and tn_eff >= N and N >= 32:          # v7x: give both TCs work
        tn_eff = _round_up(_cdiv(N, 2), 16)
    n_tiles = _cdiv(N, tn_eff)

    grid = (B, n_tiles)

    cost = pl.CostEstimate(
        flops=2 * B * N * (O * H + H * out_lanes),
        transcendentals=B * N * (H + out_lanes),
        bytes_accessed=(B * N * O * other.dtype.itemsize
                        + B * N * out_lanes * jnp.dtype(out_dt).itemsize
                        + B * H * 4
                        + (O * H + H * out_lanes) * 2 + out_lanes * 4),
    )

    res = pl.pallas_call(
        _mlp_kernel,
        out_shape=jax.ShapeDtypeStruct((B, N, out_lanes), out_dt),
        grid_spec=pltpu.PrefetchScalarGridSpec(
            num_scalar_prefetch=0,
            grid=grid,
            in_specs=[
                # per-batch focal row (kernel sees (1, H))
                pl.BlockSpec((None, 1, H), lambda b, j: (b, 0, 0)),
                # `other` rows, tiled over (batch, seq-tile); kernel sees (tn, O)
                pl.BlockSpec((None, tn_eff, O), lambda b, j: (b, j, 0)),
                # resident weights / bias
                pl.BlockSpec((O, H), lambda b, j: (0, 0)),
                pl.BlockSpec((H, out_lanes), lambda b, j: (0, 0)),
                pl.BlockSpec((1, out_lanes), lambda b, j: (0, 0)),
            ],
            out_specs=pl.BlockSpec((None, tn_eff, out_lanes),
                                   lambda b, j: (b, j, 0)),
        ),
        compiler_params=pltpu.CompilerParams(
            dimension_semantics=("parallel", "parallel"),
            vmem_limit_bytes=32 * 1024 * 1024,
        ),
        cost_estimate=cost,
    )(fc3, other, w1_o, w2_p, b2_p)

    if out_lanes != Out:
        res = res[:, :, :Out]
    return res


def init_params(key, input_size, hidden_size, output_size, dtype=jnp.float32):
    # Deterministic init mimicking nn.Linear's uniform(-1/sqrt(fan_in), 1/sqrt(fan_in)).
    k1, k2, k3, k4 = jax.random.split(key, 4)
    lim1 = 1.0 / jnp.sqrt(input_size)
    lim2 = 1.0 / jnp.sqrt(hidden_size)
    w1 = jax.random.uniform(k1, (input_size, hidden_size), dtype, -lim1, lim1)
    b1 = jax.random.uniform(k2, (hidden_size,), dtype, -lim1, lim1)
    w2 = jax.random.uniform(k3, (hidden_size, output_size), dtype, -lim2, lim2)
    b2 = jax.random.uniform(k4, (output_size,), dtype, -lim2, lim2)
    return w1, b1, w2, b2


def _ref_forward_f32(focal, other, w1, b1, w2, b2):
    B, _, F = focal.shape
    _, N, O = other.shape
    x = jnp.concatenate([jnp.broadcast_to(focal, (B, N, F)), other], axis=-1)
    h = jnp.tanh(x @ w1 + b1)
    return jax.nn.sigmoid(h @ w2 + b2)


if __name__ == "__main__":
    # Small shapes implied by forward: focal (B, 1, F), other (B, N, O),
    # input_size = F + O, hidden_size, output_size.
    B, N = 2, 8
    F, O = 16, 16
    input_size, hidden_size, output_size = F + O, 32, 8

    key = jax.random.PRNGKey(0)
    kf, ko, kp = jax.random.split(key, 3)
    focal = jax.random.normal(kf, (B, 1, F), jnp.float32)
    other = jax.random.normal(ko, (B, N, O), jnp.float32)
    w1, b1, w2, b2 = init_params(kp, input_size, hidden_size, output_size)

    out = basic_module_forward(focal, other, w1, b1, w2, b2)
    out = jax.block_until_ready(out)

    ref = _ref_forward_f32(focal, other, w1, b1, w2, b2)
    assert out.shape == (B, N, output_size)
    assert out.dtype == focal.dtype
    # bf16 MXU operands vs f32 reference: tolerance accounts for bf16 rounding.
    assert jnp.allclose(out, ref, atol=2e-2, rtol=0), "mismatch vs JAX reference"
    print("KERNEL_OK")
</pallas_src>

<mosaic_0001>
module attributes {stable_mosaic.version = 11 : i64} {
  func.func @_mlp_kernel(%arg0: i32, %arg1: i32, %arg2: memref<1x1x32xf32, #tpu.memory_space<vmem>>, %arg3: memref<1x8x16xf32, #tpu.memory_space<vmem>>, %arg4: memref<16x32xbf16, #tpu.memory_space<vmem>>, %arg5: memref<32x8xbf16, #tpu.memory_space<vmem>>, %arg6: memref<1x8xf32, #tpu.memory_space<vmem>>, %arg7: memref<1x8x8xf32, #tpu.memory_space<vmem>>) attributes {dimension_semantics = [#tpu.dimension_semantics<parallel>, #tpu.dimension_semantics<parallel>], iteration_bounds = array<i64: 2, 1>, scalar_prefetch = 0 : i64, scratch_operands = 0 : i64, tpu.core_type = #tpu.core_type<tc>, window_params = [{transform_indices = @transform_0, window_bounds = array<i64: 1, 1, 32>}, {transform_indices = @transform_1, window_bounds = array<i64: 1, 8, 16>}, {pipeline_mode = #tpu.pipeline_mode<synchronous>, transform_indices = @transform_2, window_bounds = array<i64: 16, 32>}, {pipeline_mode = #tpu.pipeline_mode<synchronous>, transform_indices = @transform_3, window_bounds = array<i64: 32, 8>}, {pipeline_mode = #tpu.pipeline_mode<synchronous>, transform_indices = @transform_4, window_bounds = array<i64: 1, 8>}, {transform_indices = @transform_5, window_bounds = array<i64: 1, 8, 8>}]} {
    %c0 = arith.constant 0 : index
    %c0_0 = arith.constant 0 : index
    %c0_1 = arith.constant 0 : index
    %0 = vector.load %arg3[%c0, %c0_0, %c0_1] : memref<1x8x16xf32, #tpu.memory_space<vmem>>, vector<1x8x16xf32>
    %1 = vector.shape_cast %0 : vector<1x8x16xf32> to vector<8x16xf32>
    %2 = arith.truncf %1 : vector<8x16xf32> to vector<8x16xbf16>
    %c0_2 = arith.constant 0 : index
    %c0_3 = arith.constant 0 : index
    %3 = vector.load %arg4[%c0_2, %c0_3] : memref<16x32xbf16, #tpu.memory_space<vmem>>, vector<16x32xbf16>
    %cst = arith.constant dense<0.000000e+00> : vector<8x32xf32>
    %4 = tpu.matmul %2, %3, %cst {dimension_numbers = #tpu.dot_dimension_numbers<[1], [0], [0], [1], [0, 0, 1, 1], [], []>} : vector<8x16xbf16>, vector<16x32xbf16>, vector<8x32xf32> -> vector<8x32xf32>
    %c0_4 = arith.constant 0 : index
    %c0_5 = arith.constant 0 : index
    %c0_6 = arith.constant 0 : index
    %5 = vector.load %arg2[%c0_4, %c0_5, %c0_6] : memref<1x1x32xf32, #tpu.memory_space<vmem>>, vector<1x1x32xf32>
    %6 = vector.shape_cast %5 : vector<1x1x32xf32> to vector<1x32xf32>
    %7 = vector.broadcast %6 : vector<1x32xf32> to vector<8x32xf32>
    %8 = arith.addf %4, %7 : vector<8x32xf32>
    %9 = math.tanh %8 : vector<8x32xf32>
    %10 = arith.truncf %9 : vector<8x32xf32> to vector<8x32xbf16>
    %c0_7 = arith.constant 0 : index
    %c0_8 = arith.constant 0 : index
    %11 = vector.load %arg5[%c0_7, %c0_8] : memref<32x8xbf16, #tpu.memory_space<vmem>>, vector<32x8xbf16>
    %cst_9 = arith.constant dense<0.000000e+00> : vector<8x8xf32>
    %12 = tpu.matmul %10, %11, %cst_9 {dimension_numbers = #tpu.dot_dimension_numbers<[1], [0], [0], [1], [0, 0, 1, 1], [], []>} : vector<8x32xbf16>, vector<32x8xbf16>, vector<8x8xf32> -> vector<8x8xf32>
    %c0_10 = arith.constant 0 : index
    %c0_11 = arith.constant 0 : index
    %13 = vector.load %arg6[%c0_10, %c0_11] : memref<1x8xf32, #tpu.memory_space<vmem>>, vector<1x8xf32>
    %14 = vector.broadcast %13 : vector<1x8xf32> to vector<8x8xf32>
    %15 = arith.addf %12, %14 : vector<8x8xf32>
    %16 = arith.negf %15 : vector<8x8xf32>
    %17 = math.exp %16 : vector<8x8xf32>
    %cst_12 = arith.constant 1.000000e+00 : f32
    %18 = vector.broadcast %cst_12 : f32 to vector<8x8xf32>
    %19 = arith.addf %18, %17 : vector<8x8xf32>
    %20 = arith.divf %18, %19 : vector<8x8xf32>
    %c0_13 = arith.constant 0 : index
    %c0_14 = arith.constant 0 : index
    %c0_15 = arith.constant 0 : index
    %21 = vector.load %arg7[%c0_13, %c0_14, %c0_15] : memref<1x8x8xf32, #tpu.memory_space<vmem>>, vector<1x8x8xf32>
    %22 = vector.shape_cast %21 : vector<1x8x8xf32> to vector<8x8xf32>
    %23 = vector.shape_cast %20 : vector<8x8xf32> to vector<1x8x8xf32>
    tpu.vector_store %arg7[%c0_13, %c0_14, %c0_15], %23 {strides = array<i32>} : memref<1x8x8xf32, #tpu.memory_space<vmem>>, vector<1x8x8xf32>,
    return
  }
  func.func @transform_0(%arg0: i32, %arg1: i32) -> (i32, i32, i32) {
    %c0_i32 = arith.constant 0 : i32
    %c0_i32_0 = arith.constant 0 : i32
    %c0_i32_1 = arith.constant 0 : i32
    return %arg0, %c0_i32, %c0_i32_0 : i32, i32, i32
  }
  func.func @transform_1(%arg0: i32, %arg1: i32) -> (i32, i32, i32) {
    %c0_i32 = arith.constant 0 : i32
    %c0_i32_0 = arith.constant 0 : i32
    return %arg0, %arg1, %c0_i32 : i32, i32, i32
  }
  func.func @transform_2(%arg0: i32, %arg1: i32) -> (i32, i32) {
    %c0_i32 = arith.constant 0 : i32
    %c0_i32_0 = arith.constant 0 : i32
    %c0_i32_1 = arith.constant 0 : i32
    return %c0_i32, %c0_i32_0 : i32, i32
  }
  func.func @transform_3(%arg0: i32, %arg1: i32) -> (i32, i32) {
    %c0_i32 = arith.constant 0 : i32
    %c0_i32_0 = arith.constant 0 : i32
    %c0_i32_1 = arith.constant 0 : i32
    return %c0_i32, %c0_i32_0 : i32, i32
  }
  func.func @transform_4(%arg0: i32, %arg1: i32) -> (i32, i32) {
    %c0_i32 = arith.constant 0 : i32
    %c0_i32_0 = arith.constant 0 : i32
    %c0_i32_1 = arith.constant 0 : i32
    return %c0_i32, %c0_i32_0 : i32, i32
  }
  func.func @transform_5(%arg0: i32, %arg1: i32) -> (i32, i32, i32) {
    %c0_i32 = arith.constant 0 : i32
    %c0_i32_0 = arith.constant 0 : i32
    return %arg0, %arg1, %c0_i32 : i32, i32, i32
  }
}

</mosaic_0001>

<bundles_post_ra>
// kernel: basic_module_forward.1
= control target key start
LH: loop header
LB: loop body
LE: loop exit
PB: predicated region body
PF: predicated region fallthrough
CT: control target
= control target key end

     0   :  { %10 = vsyncpa [#allocation3], 0  ;;  %s828_s0 = inlined_call_operand.vmem [shape: f32[2,1,32], index: 0, kind: input, shape index: {}]   ;;  %s829_s1 = inlined_call_operand.vmem [shape: f32[2,8,16], index: 1, kind: input, shape index: {}]   ;;  %s830_s2 = inlined_call_operand.vmem [shape: bf16[16,32], index: 2, kind: input, shape index: {}]   ;;  %s831_s3 = inlined_call_operand.vmem [shape: bf16[32,8], index: 3, kind: input, shape index: {}]   ;;  %s832_s4 = inlined_call_operand.vmem [shape: f32[1,8], index: 4, kind: input, shape index: {}]   ;;  %s833_s5 = inlined_call_operand.hbm [shape: f32[2,8,8], index: 5, kind: output, shape index: {}]  }
   0x1   :  { %12 = vsyncpa [#allocation3 + $0x1], 0  ;;  %s708_s18 = smov 0   ;;  %s710_s19 = smov 0  }
   0x2   :  { %s712_s20 = smov 0   ;;  %s714_s21 = smov 0  }
   0x3   :  { %s716_s22 = smov 0   ;;  %s718_s23 = smov 0  }
   0x4 LB: > { %s493_s24 = sadd.s32 4294967295, %s673_s23   ;;  %s494_s25 = sadd.s32 4294967294, %s673_s23   ;;  %s673_s23 = sphi %s718_s23, %s18_s23   ;;  %s669_s22 = sphi %s716_s22, %s840_s22   ;;  %s665_s21 = sphi %s714_s21, %s839_s21   ;;  %s661_s20 = sphi %s712_s20, %s838_s20   ;;  %s657_s19 = sphi %s710_s19, %s837_s19   ;;  %s653_s18 = sphi %s708_s18, %s836_s18  }
   0x5   : > { %s30_s26 = sadd.s32 1, %s669_s22  ;;  %s156_s27 = sadd.s32 1, %s661_s20 }
   0x6   : > { %p32_p0 = scmp.ge.s32.totalorder %s30_s26, 2  ;;  %p166_p1 = scmp.ne.s32.totalorder %s661_s20, %s657_s19 }
   0x7   : > { %p167_p2 = scmp.eq.s32.totalorder %s493_s24, 1  ;;  %p172_p3 = scmp.ne.s32.totalorder %s657_s19, %s653_s18 }
   0x8   : > { %s842_s26 = smov (%p32_p0, %s30_s26), 0  ;;  %p173_p5 = scmp.eq.s32.totalorder %s494_s25, 1 }
   0x9   : > { %p748_p4 = por %p167_p2, %p166_p1  ;;  %s151_s29 = ssub.s32 %s669_s22, %s842_s26 }
   0xa   : > { %p497_p6 = scmp.ge.s32.totalorder %s673_s23, 1  ;;  %p154_p7 = scmp.eq.s32.totalorder %s151_s29, 0 }
   0xb   : > { %p755_p8 = por %p173_p5, %p172_p3  ;;  %p216_p9 = scmp.lt.s32.totalorder %s673_s23, 3 }
   0xc   : > { %s761_s6 = scalar_select %p154_p7, %s661_s20, %s156_s27  }
   0xd   : > { %p217_p10 = pnand %p497_p6, %p216_p9 }
   0xe   : > { %p249_p11 = scmp.lt.s32.totalorder (!%p217_p10), %s665_s21, 1  ;;  %s246_s8 = sand.u32 (!%p217_p10), 1, %s657_s19  }
   0xf   : > { %220 = sbr.rel (%p217_p10) target bundleno = 478 (0x1de), region = 40  ;;  %s399_s16 = scalar_lea.sflag (!%p217_p10), [#allocation3], %s246_s8 }
  0x10   : > { %s677_s24 = smov (!%p217_p10), [#allocation2]  }
  0x11   : > { %s601_s25 = sshll.u32 (!%p217_p10), %s677_s24, 4  ;;  %s602_s25 = int_to_ptr.vmem [resolvable:$false] %s601_s25 }
  0x14   : > { %v588_v0 = vld [vmem:[%s830_s2] sm:$0xff]   ;;  %v675_v1 = vmov 0.0   ;;  %vm676_vm0 = vmmov 0   ;;  %s250_s9 = scalar_select %p249_p11, %s665_s21, 1  ;;  %vm277_vm1 = vcmask 130048   ;;  %v589_v4 = vld [vmem:[%s831_s3 + $0x8] sm:$0xff]  }
  0x15   : > { %517 = vmatprep.subr.bf16.mxu0 %v675_v1  ;;  %523 = vmatprep.subr.bf16.mxu1 %v675_v1  ;;  %v590_v5 = vld [vmem:[%s831_s3] sm:$0xff]   ;;  %vm346_vm2 = vcmask 261120   ;;  %vm396_vm3 = vcmask 64512  }
  0x16   : > { %518 = vmatpush3.bf16.msra.mxu0 %v588_v0  ;;  %519 = vmatprep.mubr.msk.bf16.mxu0 %vm676_vm0, %v675_v1  ;;  %s499_s10 = sshll.u32 %s250_s9, 3  ;;  %s251_s27 = scalar_lea.vmem %s828_s0, %s250_s9  ;;  %v503_v14 = vld [vmem:[%s832_s4] ss:$0 sm:$0xff] }
  0x17   : > { %527 = vmatprep.mubr.msk.bf16.mxu1 %vm676_vm0, %v675_v1  ;;  %s258_s13 = scalar_lea.vmem %s829_s1, %s499_s10  ;;  %524 = vmatpush3.bf16.msra.mxu1 %v589_v4  ;;  %v500_v6 = vld [vmem:[%s251_s27] ss:$0 sm:$0xff]  ;;  %s498_s9 = sshll.u32 %s246_s8, 3 }
  0x18   : > { %v260_v2 = vld [vmem:[%s258_s13] sm:$0xff]  ;;  %525 = vmatprep.subr.bf16.mxu1 %v675_v1  ;;  %s509_s10 = sshll.u32 %s665_s21, 7  ;;  %s248_s11 = scalar_lea.vmem [#allocation2], %s498_s9 }
  0x19   : > { %v261_v3 = vpack.c.bf16 %v260_v2, %v260_v2  ;;  %s413_s12 = sshll.u32 %s248_s11, 4  ;;  %s788_s15 = scalar_lea.hbm %s833_s5, %s509_s10  ;;  %s414_s12 = int_to_ptr.vmem [resolvable:$true] %s413_s12 }
  0x1a   : > { %s597_s17 = scalar_lea.vmem %s414_s12, 128  ;;  %s603_s21 = scalar_lea.vmem %s602_s25, 256 }
  0x1b   : > { %520 = vmatmul.mubr.msk.bf16.vlgmr.msra.gmra.mxu0 %vm277_vm1, %v261_v3  ;;  %526 = vmatpush3.bf16.msra.mxu1 %v590_v5  ;;  %p598_p12 = scmp.ne.s32.totalorder %s414_s12, %s597_s17  ;;  %p604_p1 = scmp.lt.s32.totalorder %s414_s12, %s602_s25 }
  0x1c   : > { %p605_p2 = scmp.lt.s32.totalorder %s603_s21, %s597_s17 }
  0x1d   : > { %p599_p13 = pnand %p598_p12, %p748_p4 }
  0x1e   : > { %p606_p3 = por %p605_p2, %p604_p1 }
  0x1f   : > { %p600_p0 = pneg %p599_p13 }
  0x21   : > { %p607_p5 = pnand %p606_p3, %p600_p0 }
  0xdb   : > { %v315_v7 = vpop.f32.mrf.mxu0 }
  0xdc   : > { %v316_v8 = vadd.f32 %v500_v6, %v315_v7 }
  0xdd   : > { %v521_v9 = vpop.f32.mrf.mxu0 }
  0xde   : > { %591 = vtanh.f32 %v316_v8 }
  0xdf   : > { %v318_v10 = vpop.f32.mrf.mxu0 }
  0xe1   : > { %v522_v11 = vpop.f32.mrf.mxu0 }
  0xeb   : > { %v592_v12 = vpop.eup %591 }
  0xec   : > { %v322_v13 = vpack.c.bf16 %v592_v12, %v592_v12 }
  0xee   : > { %528 = vmatmul.mubr.msk.bf16.vlgmr.msra.gmra.mxu1 %vm346_vm2, %v322_v13 }
 0x1ae   : > { %v384_v15 = vpop.f32.mrf.mxu1 }
 0x1af   : > { %v385_v16 = vadd.f32 %v503_v14, %v384_v15 }
 0x1b0   : > { %v529_v17 = vpop.f32.mrf.mxu1 }
 0x1b1   : > { %v507_v18 = vmul.f32 -1.442695, %v385_v16 }
 0x1b2   : > { %v387_v19 = vpop.f32.mrf.mxu1 }
 0x1b3   : > { %593 = vpow2.f32 %v507_v18 }
 0x1b4   : > { %v530_v20 = vpop.f32.mrf.mxu1 }
 0x1c0   : > { %v594_v21 = vpop.eup %593 }
 0x1c1   : > { %v393_v22 = vadd.f32 1.0, %v594_v21 }
 0x1c3   : > { %595 = vrcp.f32 %v393_v22 }
 0x1d0   : > { %v596_v23 = vpop.eup %595 }
 0x1d1   : > { %397 = vst.msk [vmem:[%s248_s11] sm:$0xff] %vm396_vm3, %v596_v23 }
 0x1d2   : > { %610 = shalt.err (!%p607_p5)
}
 0x1d3   : > { %s611_s27 = scalar_lea.hbm %s788_s15, 128  ;;  %s615_s8 = scalar_lea.hbm %s833_s5, 256 }
 0x1d4   : > { %p612_p6 = scmp.ne.s32.totalorder %s788_s15, %s611_s27  ;;  %p616_p10 = scmp.lt.s32.totalorder %s788_s15, %s833_s5 }
 0x1d5   : > { %p617_p11 = scmp.lt.s32.totalorder %s615_s8, %s611_s27 }
 0x1d6   : > { %p613_p7 = pnand %p612_p6, %p748_p4 }
 0x1d7   : > { %p618_p12 = por %p617_p11, %p616_p10 }
 0x1d8   : > { %p614_p9 = pneg %p613_p7 }
 0x1da   : > { %p619_p13 = pnand %p618_p12, %p614_p9 }
 0x1dc   : > { %622 = shalt.err (!%p619_p13)
}
 0x1dd   : > { %531 = dma.vmem_to_hbm [thread:$0]  (%p748_p4), %s414_s12, 128, %s788_s15, %s399_s16  }
 0x1de PF: > { %p537_p0 = scmp.ge.s32.totalorder %s673_s23, 2  ;;  %s425_s11 = sand.u32 1, %s653_s18  }
 0x1df   : > { %s426_s13 = scalar_lea.sflag [#allocation3], %s425_s11 }
 0x1e0   : > { %p534_p1 = pnand %p537_p0, %p755_p8 }
 0x1e2   : > { %p535_p2 = pneg %p534_p1 }
 0x1e4   : > { %648 = dma.done.wait (%p535_p2), %s426_s13, 128  }
 0x1e5   : > { %650 = vsyncadd (%p535_p2), %s426_s13, 4294967168  ;;  %s18_s23 = sadd.s32 1, %s673_s23   ;;  %s836_s18 = smov %s657_s19 }
 0x1e6   : > { %p15_p3 = scmp.ge.s32.totalorder %s18_s23, 4   ;;  %s837_s19 = smov %s661_s20 }
 0x1e7   : > { %s838_s20 = smov %s761_s6  ;;  %s839_s21 = smov %s669_s22 }
 0x1e8   : > { %s840_s22 = smov %s842_s26  ;;  %17 = sbr.rel (!%p15_p3) target bundleno = 4 (0x4), region = 78 }
 0x1ed   :  { %431 = vsyncpa [#allocation3], 1 }
 0x1ee   :  { %433 = vsyncpa [#allocation3 + $0x1], 1 }

</bundles_post_ra>
